<compile_context>
chip_gen: v7x
topology: tpu7x:2x2x1
jax: 0.10.0
libtpu: 0.0.40
codegen_flags: <defaults>
</compile_context>

<pallas_src>
import functools

import jax
import jax.numpy as jnp
import numpy as np
from jax.experimental import pallas as pl
from jax.experimental.pallas import tpu as pltpu


def _round_up(x, m):
    return (x + m - 1) // m * m


def _multifreq_kernel(pred_ref, tgt_ref, omega_ref, freq_out_ref, l1_out_ref,
                      freq_acc, l1_acc, *, kpad, tb):
    p = pl.program_id(1)

    @pl.when(p == 0)
    def _():
        freq_acc[...] = jnp.zeros_like(freq_acc)
        l1_acc[...] = jnp.zeros_like(l1_acc)

    d = pred_ref[0] - tgt_ref[...]                            # (TB, HW) f32

    # Single MXU GEMM: combined 2-D rFFT operator, [real | imag] lane-padded.
    fft = jnp.dot(d, omega_ref[...],
                  preferred_element_type=jnp.float32)          # (TB, 2*Kpad)
    real = fft[:, :kpad]                                       # lane-aligned slice
    imag = fft[:, kpad:]

    # Elementwise accumulation only (VPU) in the hot loop.
    freq_acc[...] += jnp.sqrt(real * real + imag * imag)
    l1_acc[...] += jnp.abs(d)

    @pl.when(p == pl.num_programs(1) - 1)
    def _():
        # Fold TB rows down to 8 rows with tile-aligned static slices (vreg adds),
        # store lane-dense (8, Kpad)/(8, HW) partials; final reduce is in the wrapper.
        fp = freq_acc[0:8, :]
        lp = l1_acc[0:8, :]
        for g in range(1, tb // 8):
            fp = fp + freq_acc[8 * g:8 * (g + 1), :]
            lp = lp + l1_acc[8 * g:8 * (g + 1), :]
        freq_out_ref[0] = fp
        l1_out_ref[0] = lp


def _rfft2_operator(h, w, kpad):
    """Combined real rFFT2 operator: (H*W, 2*Kpad) with [real | imag] halves,
    each zero-padded from H*Wr to Kpad lanes (zero columns contribute 0)."""
    wr = w // 2 + 1
    m = np.arange(h).reshape(h, 1, 1, 1)
    n = np.arange(w).reshape(1, w, 1, 1)
    k = np.arange(h).reshape(1, 1, h, 1)
    l = np.arange(wr).reshape(1, 1, 1, wr)
    ang = 2.0 * np.pi * (k * m / h + l * n / w)                # (h, w, h, wr) f64
    omega_r = np.cos(ang).reshape(h * w, h * wr)
    omega_i = (-np.sin(ang)).reshape(h * w, h * wr)
    pad = kpad - h * wr
    if pad:
        z = np.zeros((h * w, pad), np.float64)
        omega_r = np.concatenate([omega_r, z], axis=1)
        omega_i = np.concatenate([omega_i, z], axis=1)
    omega = np.concatenate([omega_r, omega_i], axis=1).astype(np.float32)
    return jnp.asarray(omega)


@functools.partial(jax.jit, static_argnames=("loss_weight",))
def multi_freq_loss(pred_stack, target, loss_weight=1.0):
    """pred_stack: (P, N, C, H, W) float32; target: (N, C, H, W) float32."""
    P, N, C, H, W = pred_stack.shape
    Wr = W // 2 + 1
    NC = N * C
    HW = H * W
    Kout = H * Wr
    Kpad = _round_up(max(Kout, 128), 128)

    # Images per grid step (rows of the GEMM). Multiple of 8 for sublane tiling.
    TB = min(128, _round_up(NC, 8))
    NC_pad = _round_up(NC, TB)
    NB = NC_pad // TB

    pred = pred_stack.reshape(P, NC, HW).astype(jnp.float32)
    tgt = target.reshape(NC, HW).astype(jnp.float32)
    if NC_pad != NC:
        pad_rows = NC_pad - NC
        # Zero-padded rows give diff == 0 -> contribute 0 to both sums.
        pred = jnp.pad(pred, ((0, 0), (0, pad_rows), (0, 0)))
        tgt = jnp.pad(tgt, ((0, pad_rows), (0, 0)))

    omega = _rfft2_operator(H, W, Kpad)                        # (HW, 2*Kpad) f32

    kernel = functools.partial(_multifreq_kernel, kpad=Kpad, tb=TB)

    cost = pl.CostEstimate(
        flops=2 * P * NC_pad * HW * 2 * Kpad + 6 * P * NC_pad * (Kpad + HW),
        transcendentals=P * NC_pad * Kpad,
        bytes_accessed=(P * NC_pad + NC_pad) * HW * 4
        + HW * 2 * Kpad * 4
        + NB * 8 * (Kpad + HW) * 4,
    )

    freq_part, l1_part = pl.pallas_call(
        kernel,
        out_shape=(jax.ShapeDtypeStruct((NB, 8, Kpad), jnp.float32),
                   jax.ShapeDtypeStruct((NB, 8, HW), jnp.float32)),
        grid=(NB, P),
        in_specs=[
            # predictions: new block every step
            pl.BlockSpec((1, TB, HW), lambda b, p: (p, b, 0)),
            # target: index depends only on b -> stays resident across the P inner steps
            pl.BlockSpec((TB, HW), lambda b, p: (b, 0)),
            # DFT operator: constant block, loaded once
            pl.BlockSpec((HW, 2 * Kpad), lambda b, p: (0, 0)),
        ],
        out_specs=(pl.BlockSpec((1, 8, Kpad), lambda b, p: (b, 0, 0)),
                   pl.BlockSpec((1, 8, HW), lambda b, p: (b, 0, 0))),
        scratch_shapes=[pltpu.VMEM((TB, Kpad), jnp.float32),
                        pltpu.VMEM((TB, HW), jnp.float32)],
        compiler_params=pltpu.CompilerParams(
            dimension_semantics=("parallel", "arbitrary"),
            vmem_limit_bytes=32 * 1024 * 1024),
        cost_estimate=cost,
    )(pred, tgt, omega)

    # sum_p mean_p(x) = total_sum / (elements per prediction); padded rows are 0.
    freq_term = jnp.sum(freq_part) / jnp.float32(NC * H * Wr)
    l1_term = jnp.sum(l1_part) / jnp.float32(NC * H * W)
    return loss_weight * 0.01 * freq_term + loss_weight * l1_term


def _reference(pred_list, target, loss_weight=1.0):
    loss = 0.0
    for p in pred_list:
        diff = jnp.fft.rfft2(p) - jnp.fft.rfft2(target)
        freq = jnp.mean(jnp.abs(diff))
        l1 = jnp.mean(jnp.abs(p - target))
        loss = loss + loss_weight * 0.01 * freq + loss_weight * l1
    return loss


if __name__ == "__main__":
    key = jax.random.PRNGKey(0)
    P, N, C, H, W = 2, 2, 4, 16, 16
    k1, k2, k3 = jax.random.split(key, 3)
    pred0 = jax.random.normal(k1, (N, C, H, W), dtype=jnp.float32)
    pred1 = jax.random.normal(k2, (N, C, H, W), dtype=jnp.float32)
    target = jax.random.normal(k3, (N, C, H, W), dtype=jnp.float32)

    pred_stack = jnp.stack([pred0, pred1], axis=0)  # (P, N, C, H, W)

    out = multi_freq_loss(pred_stack, target, loss_weight=1.0)
    out = jax.block_until_ready(out)

    ref = _reference([pred0, pred1], target, loss_weight=1.0)
    np.testing.assert_allclose(np.asarray(out), np.asarray(ref),
                               rtol=1e-4, atol=1e-4)
    print("KERNEL_OK")
</pallas_src>

<mosaic_0001>
module attributes {stable_mosaic.version = 11 : i64} {
  func.func @_multifreq_kernel(%arg0: i32, %arg1: i32, %arg2: memref<1x8x256xf32, #tpu.memory_space<vmem>>, %arg3: memref<8x256xf32, #tpu.memory_space<vmem>>, %arg4: memref<256x512xf32, #tpu.memory_space<vmem>>, %arg5: memref<1x8x256xf32, #tpu.memory_space<vmem>>, %arg6: memref<1x8x256xf32, #tpu.memory_space<vmem>>, %arg7: memref<8x256xf32, #tpu.memory_space<vmem>>, %arg8: memref<8x256xf32, #tpu.memory_space<vmem>>) attributes {dimension_semantics = [#tpu.dimension_semantics<parallel>, #tpu.dimension_semantics<arbitrary>], iteration_bounds = array<i64: 1, 2>, scalar_prefetch = 0 : i64, scratch_operands = 2 : i64, tpu.core_type = #tpu.core_type<tc>, window_params = [{transform_indices = @transform_0, window_bounds = array<i64: 1, 8, 256>}, {transform_indices = @transform_1, window_bounds = array<i64: 8, 256>}, {pipeline_mode = #tpu.pipeline_mode<synchronous>, transform_indices = @transform_2, window_bounds = array<i64: 256, 512>}, {transform_indices = @transform_3, window_bounds = array<i64: 1, 8, 256>}, {transform_indices = @transform_4, window_bounds = array<i64: 1, 8, 256>}]} {
    %c0_i32 = arith.constant 0 : i32
    %0 = arith.cmpi eq, %arg1, %c0_i32 : i32
    %1 = arith.extui %0 : i1 to i32
    %c0_i32_0 = arith.constant 0 : i32
    %2 = arith.cmpi ne, %1, %c0_i32_0 : i32
    scf.if %2 {
      %cst_16 = arith.constant 0.000000e+00 : f32
      %25 = vector.broadcast %cst_16 : f32 to vector<8x256xf32>
      %c0_17 = arith.constant 0 : index
      %c0_18 = arith.constant 0 : index
      %26 = vector.load %arg7[%c0_17, %c0_18] : memref<8x256xf32, #tpu.memory_space<vmem>>, vector<8x256xf32>
      tpu.vector_store %arg7[%c0_17, %c0_18], %25 {strides = array<i32>} : memref<8x256xf32, #tpu.memory_space<vmem>>, vector<8x256xf32>,
      %cst_19 = arith.constant 0.000000e+00 : f32
      %27 = vector.broadcast %cst_19 : f32 to vector<8x256xf32>
      %c0_20 = arith.constant 0 : index
      %c0_21 = arith.constant 0 : index
      %28 = vector.load %arg8[%c0_20, %c0_21] : memref<8x256xf32, #tpu.memory_space<vmem>>, vector<8x256xf32>
      tpu.vector_store %arg8[%c0_20, %c0_21], %27 {strides = array<i32>} : memref<8x256xf32, #tpu.memory_space<vmem>>, vector<8x256xf32>,
    } else {
    }
    %c0 = arith.constant 0 : index
    %c0_1 = arith.constant 0 : index
    %c0_2 = arith.constant 0 : index
    %3 = vector.load %arg2[%c0, %c0_1, %c0_2] : memref<1x8x256xf32, #tpu.memory_space<vmem>>, vector<1x8x256xf32>
    %4 = vector.shape_cast %3 : vector<1x8x256xf32> to vector<8x256xf32>
    %c0_3 = arith.constant 0 : index
    %c0_4 = arith.constant 0 : index
    %5 = vector.load %arg3[%c0_3, %c0_4] : memref<8x256xf32, #tpu.memory_space<vmem>>, vector<8x256xf32>
    %6 = arith.subf %4, %5 : vector<8x256xf32>
    %c0_5 = arith.constant 0 : index
    %c0_6 = arith.constant 0 : index
    %7 = vector.load %arg4[%c0_5, %c0_6] : memref<256x512xf32, #tpu.memory_space<vmem>>, vector<256x512xf32>
    %cst = arith.constant dense<0.000000e+00> : vector<8x512xf32>
    %8 = tpu.matmul %6, %7, %cst {dimension_numbers = #tpu.dot_dimension_numbers<[1], [0], [0], [1], [0, 0, 1, 1], [], []>} : vector<8x256xf32>, vector<256x512xf32>, vector<8x512xf32> -> vector<8x512xf32>
    %9 = vector.extract_strided_slice %8 {offsets = [0, 0], sizes = [8, 256], strides = [1, 1]} : vector<8x512xf32> to vector<8x256xf32>
    %10 = vector.extract_strided_slice %8 {offsets = [0, 256], sizes = [8, 256], strides = [1, 1]} : vector<8x512xf32> to vector<8x256xf32>
    %c0_7 = arith.constant 0 : index
    %c0_8 = arith.constant 0 : index
    %11 = vector.load %arg7[%c0_7, %c0_8] : memref<8x256xf32, #tpu.memory_space<vmem>>, vector<8x256xf32>
    %12 = arith.mulf %9, %9 : vector<8x256xf32>
    %13 = arith.mulf %10, %10 : vector<8x256xf32>
    %14 = arith.addf %12, %13 : vector<8x256xf32>
    %15 = math.sqrt %14 : vector<8x256xf32>
    %16 = arith.addf %11, %15 : vector<8x256xf32>
    %c0_9 = arith.constant 0 : index
    %c0_10 = arith.constant 0 : index
    %17 = vector.load %arg7[%c0_9, %c0_10] : memref<8x256xf32, #tpu.memory_space<vmem>>, vector<8x256xf32>
    tpu.vector_store %arg7[%c0_9, %c0_10], %16 {strides = array<i32>} : memref<8x256xf32, #tpu.memory_space<vmem>>, vector<8x256xf32>,
    %c0_11 = arith.constant 0 : index
    %c0_12 = arith.constant 0 : index
    %18 = vector.load %arg8[%c0_11, %c0_12] : memref<8x256xf32, #tpu.memory_space<vmem>>, vector<8x256xf32>
    %19 = math.absf %6 : vector<8x256xf32>
    %20 = arith.addf %18, %19 : vector<8x256xf32>
    %c0_13 = arith.constant 0 : index
    %c0_14 = arith.constant 0 : index
    %21 = vector.load %arg8[%c0_13, %c0_14] : memref<8x256xf32, #tpu.memory_space<vmem>>, vector<8x256xf32>
    tpu.vector_store %arg8[%c0_13, %c0_14], %20 {strides = array<i32>} : memref<8x256xf32, #tpu.memory_space<vmem>>, vector<8x256xf32>,
    %c1_i32 = arith.constant 1 : i32
    %22 = arith.cmpi eq, %arg1, %c1_i32 : i32
    %23 = arith.extui %22 : i1 to i32
    %c0_i32_15 = arith.constant 0 : i32
    %24 = arith.cmpi ne, %23, %c0_i32_15 : i32
    scf.if %24 {
      %c0_16 = arith.constant 0 : index
      %c0_17 = arith.constant 0 : index
      %25 = vector.load %arg7[%c0_16, %c0_17] : memref<8x256xf32, #tpu.memory_space<vmem>>, vector<8x256xf32>
      %c0_18 = arith.constant 0 : index
      %c0_19 = arith.constant 0 : index
      %26 = vector.load %arg8[%c0_18, %c0_19] : memref<8x256xf32, #tpu.memory_space<vmem>>, vector<8x256xf32>
      %c0_20 = arith.constant 0 : index
      %c0_21 = arith.constant 0 : index
      %c0_22 = arith.constant 0 : index
      %27 = vector.load %arg5[%c0_20, %c0_21, %c0_22] : memref<1x8x256xf32, #tpu.memory_space<vmem>>, vector<1x8x256xf32>
      %28 = vector.shape_cast %27 : vector<1x8x256xf32> to vector<8x256xf32>
      %29 = vector.shape_cast %25 : vector<8x256xf32> to vector<1x8x256xf32>
      tpu.vector_store %arg5[%c0_20, %c0_21, %c0_22], %29 {strides = array<i32>} : memref<1x8x256xf32, #tpu.memory_space<vmem>>, vector<1x8x256xf32>,
      %c0_23 = arith.constant 0 : index
      %c0_24 = arith.constant 0 : index
      %c0_25 = arith.constant 0 : index
      %30 = vector.load %arg6[%c0_23, %c0_24, %c0_25] : memref<1x8x256xf32, #tpu.memory_space<vmem>>, vector<1x8x256xf32>
      %31 = vector.shape_cast %30 : vector<1x8x256xf32> to vector<8x256xf32>
      %32 = vector.shape_cast %26 : vector<8x256xf32> to vector<1x8x256xf32>
      tpu.vector_store %arg6[%c0_23, %c0_24, %c0_25], %32 {strides = array<i32>} : memref<1x8x256xf32, #tpu.memory_space<vmem>>, vector<1x8x256xf32>,
    } else {
    }
    return
  }
  func.func @transform_0(%arg0: i32, %arg1: i32) -> (i32, i32, i32) {
    %c0_i32 = arith.constant 0 : i32
    %c0_i32_0 = arith.constant 0 : i32
    return %arg1, %arg0, %c0_i32 : i32, i32, i32
  }
  func.func @transform_1(%arg0: i32, %arg1: i32) -> (i32, i32) {
    %c0_i32 = arith.constant 0 : i32
    %c0_i32_0 = arith.constant 0 : i32
    return %arg0, %c0_i32 : i32, i32
  }
  func.func @transform_2(%arg0: i32, %arg1: i32) -> (i32, i32) {
    %c0_i32 = arith.constant 0 : i32
    %c0_i32_0 = arith.constant 0 : i32
    %c0_i32_1 = arith.constant 0 : i32
    return %c0_i32, %c0_i32_0 : i32, i32
  }
  func.func @transform_3(%arg0: i32, %arg1: i32) -> (i32, i32, i32) {
    %c0_i32 = arith.constant 0 : i32
    %c0_i32_0 = arith.constant 0 : i32
    %c0_i32_1 = arith.constant 0 : i32
    return %arg0, %c0_i32, %c0_i32_0 : i32, i32, i32
  }
  func.func @transform_4(%arg0: i32, %arg1: i32) -> (i32, i32, i32) {
    %c0_i32 = arith.constant 0 : i32
    %c0_i32_0 = arith.constant 0 : i32
    %c0_i32_1 = arith.constant 0 : i32
    return %arg0, %c0_i32, %c0_i32_0 : i32, i32, i32
  }
}

</mosaic_0001>

<bundles_post_ra>
// kernel: multi_freq_loss.1
= control target key start
LH: loop header
LB: loop body
LE: loop exit
PB: predicated region body
PF: predicated region fallthrough
CT: control target
= control target key end

     0   :  { %10 = vsyncpa [#allocation5], 0  ;;  %s1000_s15 = smov 0   ;;  %s1002_s16 = smov 0   ;;  %s1102_s0 = inlined_call_operand.vmem [shape: f32[2,8,256], index: 0, kind: input, shape index: {}]   ;;  %s1103_s1 = inlined_call_operand.vmem [shape: f32[8,256], index: 1, kind: input, shape index: {}]   ;;  %s1104_s2 = inlined_call_operand.hbm [shape: f32[256,512], index: 2, kind: input, shape index: {}]   ;;  %s1105_s3 = inlined_call_operand.vmem [shape: f32[1,8,256], index: 3, kind: output, shape index: {0}]   ;;  %s1106_s4 = inlined_call_operand.vmem [shape: f32[1,8,256], index: 4, kind: output, shape index: {1}]  }
   0x1   :  { %s1004_s17 = smov 0  }
   0x2 LB: > { %s729_s18 = sadd.s32 4294967295, %s969_s17   ;;  %s25_s19 = sadd.s32 1, %s965_s16  ;;  %s969_s17 = sphi %s1004_s17, %s16_s17   ;;  %s965_s16 = sphi %s1002_s16, %s1116_s16   ;;  %s961_s15 = sphi %s1000_s15, %s1115_s15  }
   0x3   : > { %p26_p0 = scmp.ge.s32.totalorder %s25_s19, 2  ;;  %p730_p1 = scmp.ge.s32.totalorder %s969_s17, 1 }
   0x4   : > { %p160_p2 = scmp.lt.s32.totalorder %s969_s17, 3  ;;  %p1025_p4 = scmp.eq.s32.totalorder %s729_s18, 0 }
   0x5   : > { %s1118_s19 = smov (%p26_p0, %s25_s19), 0  ;;  %s971_s22 = smov [#allocation4]  }
   0x6   : > { %p1021_p3 = pnand %p730_p1, %p160_p2  ;;  %s180_s23 = sshll.u32 %s971_s22, 4  ;;  %s181_s23 = int_to_ptr.vmem [resolvable:$true] %s180_s23 }
   0x7   : > { %s1111_s21 = scalar_select %p1025_p4, 1, 0 }
   0x8   : > { %s1110_s20 = scalar_select %p1021_p3, 1, 0 }
   0x9   : > { %p877_p5 = pneg %p1021_p3  ;;  %s915_s27 = scalar_lea.hbm %s1104_s2, 16384 }
   0xa   : > { %p916_p7 = scmp.ne.s32.totalorder %s1104_s2, %s915_s27  ;;  %p922_p11 = scmp.lt.u32.totalorder %s915_s27, %s1104_s2 }
   0xb   : > { %p1033_p6 = pnand %p1025_p4, %p877_p5 }
   0xd   : > { %p917_p8 = pneg %p1033_p6 }
   0xf   : > { %p918_p9 = pnand %p917_p8, %p916_p7 }
  0x11   : > { %p919_p10 = pneg %p918_p9 }
  0x13   : > { %p924_p12 = pnand %p922_p11, %p919_p10 }
  0x15   : > { %927 = shalt.err (!%p924_p12)
}
  0x16   : > { %s928_s6 = scalar_lea.vmem %s181_s23, 16384  ;;  %p936_p2 = scmp.lt.s32.totalorder %s181_s23, %s181_s23 }
  0x17   : > { %p929_p13 = scmp.ne.s32.totalorder %s181_s23, %s928_s6  ;;  %p937_p5 = scmp.lt.s32.totalorder %s928_s6, %s928_s6 }
  0x19   : > { %p931_p0 = pnand %p929_p13, %p917_p8  ;;  %p938_p4 = por %p937_p5, %p936_p2 }
  0x1b   : > { %p932_p1 = pneg %p931_p0 }
  0x1d   : > { %p939_p3 = pnand %p938_p4, %p932_p1 }
  0x1f   : > { %942 = shalt.err (!%p939_p3)
}
  0x20   : > { %s972_s7 = smov 512   ;;  %s973_s8 = smov 32  }
  0x21   : > { %880 = dma.hbm_to_vmem [thread:$0]  (!%p1033_p6), %s1104_s2, 16384, %s181_s23, [#allocation5], %s972_s7, %s972_s7, %s973_s8  }
  0x22   : > { %p1113_p7 = scmp.ne.s32.totalorder %s1110_s20, 0 }
  0x23   : > { %p1114_p9 = scmp.ne.s32.totalorder (!%p1113_p7), %s1111_s21, 0 }
  0x24   : > { %208 = sbr.rel (%p1113_p7) target bundleno = 366 (0x16e), region = 32 }
  0x2b   : > { %956 = dma.done.wait (%p1114_p9), [#allocation5], 16384  }
  0x2c   : > { %958 = vsyncadd (%p1114_p9), [#allocation5], 4294950912  ;;  %p248_p3 = scmp.lt.s32.totalorder %s961_s15, 1  ;;  %p738_p4 = scmp.ne.s32.totalorder %s961_s15, 0 }
  0x2d   : > { %v974_v0 = vmov (!%p738_p4), 0.0  }
  0x2e   : > { %s249_s11 = scalar_select %p248_p3, %s961_s15, 1 }
  0x2f   : > { %275 = sbr.rel (%p738_p4) target bundleno = 54 (0x36), region = 40  ;;  %276 = vst [vmem:[#allocation2] sm:$0xff] (!%p738_p4), %v974_v0  ;;  %277 = vst [vmem:[#allocation2 + $0x8] sm:$0xff] (!%p738_p4), %v974_v0 }
  0x30   : > { %s744_s12 = sshll.u32 %s249_s11, 4  ;;  %278 = vst [vmem:[#allocation3] sm:$0xff] (!%p738_p4), %v974_v0  ;;  %279 = vst [vmem:[#allocation3 + $0x8] sm:$0xff] (!%p738_p4), %v974_v0 }
  0x31   : > { %s1064_s18 = scalar_lea.vmem %s1102_s0, %s744_s12 }
  0x36 PF: > { %v287_v1 = vld [vmem:[#allocation4 + $0x8] sm:$0xff]  ;;  %v289_v3 = vld [vmem:[#allocation4 + $0x18] sm:$0xff]  ;;  %v286_v6 = vld [vmem:[#allocation4] sm:$0xff]  ;;  %p739_p6 = scmp.ne.s32.totalorder %s961_s15, 1 }
  0x37   : > { %v291_v2 = vld [vmem:[#allocation4 + $0x28] sm:$0xff]  ;;  %v293_v5 = vld [vmem:[#allocation4 + $0x38] sm:$0xff]  ;;  %v290_v7 = vld [vmem:[#allocation4 + $0x20] sm:$0xff] }
  0x38   : > { %v745_v4 = vpack.c.bf16 %v291_v2, %v287_v1  ;;  %v809_v8 = vpack.c.bf16 %v293_v5, %v289_v3  ;;  %v747_v9 = vpack.c.bf16 %v290_v7, %v286_v6  ;;  %v288_v10 = vld [vmem:[#allocation4 + $0x10] sm:$0xff]  ;;  %v295_v12 = vld [vmem:[#allocation4 + $0x48] sm:$0xff]  ;;  %v297_v15 = vld [vmem:[#allocation4 + $0x58] sm:$0xff] }
  0x39   : > { %v292_v11 = vld [vmem:[#allocation4 + $0x30] sm:$0xff]  ;;  %v299_v14 = vld [vmem:[#allocation4 + $0x68] sm:$0xff]  ;;  %v301_v16 = vld [vmem:[#allocation4 + $0x78] sm:$0xff] }
  0x3a   : > { %746 = vmatprep.subr.bf16.mxu0 %v745_v4  ;;  %v811_v13 = vpack.c.bf16 %v292_v11, %v288_v10  ;;  %810 = vmatprep.subr.bf16.mxu1 %v809_v8  ;;  %v749_v17 = vpack.c.bf16 %v299_v14, %v295_v12  ;;  %v813_v18 = vpack.c.bf16 %v301_v16, %v297_v15  ;;  %v294_v19 = vld [vmem:[#allocation4 + $0x40] sm:$0xff]  ;;  %v296_v21 = vld [vmem:[#allocation4 + $0x50] sm:$0xff]  ;;  %v303_v24 = vld [vmem:[#allocation4 + $0x88] sm:$0xff] }
  0x3b   : > { %748 = vmatpush1.bf16.msra.mxu0 %v747_v9  ;;  %v298_v20 = vld [vmem:[#allocation4 + $0x60] sm:$0xff]  ;;  %v300_v23 = vld [vmem:[#allocation4 + $0x70] sm:$0xff]  ;;  %v307_v25 = vld [vmem:[#allocation4 + $0xa8] sm:$0xff] }
  0x3c   : > { %812 = vmatpush1.bf16.msra.mxu1 %v811_v13  ;;  %v751_v22 = vpack.c.bf16 %v298_v20, %v294_v19  ;;  %750 = vmatprep.subr.bf16.mxu0 %v749_v17  ;;  %v815_v26 = vpack.c.bf16 %v300_v23, %v296_v21  ;;  %v753_v27 = vpack.c.bf16 %v307_v25, %v303_v24  ;;  %v305_v28 = vld [vmem:[#allocation4 + $0x98] sm:$0xff]  ;;  %v302_v30 = vld [vmem:[#allocation4 + $0x80] sm:$0xff]  ;;  %v304_v33 = vld [vmem:[#allocation4 + $0x90] sm:$0xff] }
  0x3d   : > { %814 = vmatprep.subr.bf16.mxu1 %v813_v18  ;;  %v309_v29 = vld [vmem:[#allocation4 + $0xb8] sm:$0xff]  ;;  %v306_v32 = vld [vmem:[#allocation4 + $0xa0] sm:$0xff]  ;;  %v308_v34 = vld [vmem:[#allocation4 + $0xb0] sm:$0xff] }
  0x3e   : > { %v817_v31 = vpack.c.bf16 %v309_v29, %v305_v28  ;;  %v755_v35 = vpack.c.bf16 %v306_v32, %v302_v30  ;;  %v311_v36 = vld [vmem:[#allocation4 + $0xc8] sm:$0xff]  ;;  %v313_v38 = vld [vmem:[#allocation4 + $0xd8] sm:$0xff]  ;;  %v819_v39 = vpack.c.bf16 %v308_v34, %v304_v33  ;;  %v310_v42 = vld [vmem:[#allocation4 + $0xc0] sm:$0xff] }
  0x3f   : > { %752 = vmatpush1.bf16.msra.mxu0 %v751_v22  ;;  %v315_v37 = vld [vmem:[#allocation4 + $0xe8] sm:$0xff]  ;;  %v317_v41 = vld [vmem:[#allocation4 + $0xf8] sm:$0xff]  ;;  %v314_v43 = vld [vmem:[#allocation4 + $0xe0] sm:$0xff] }
  0x40   : > { %816 = vmatpush1.bf16.msra.mxu1 %v815_v26  ;;  %754 = vmatprep.subr.bf16.mxu0 %v753_v27  ;;  %v757_v40 = vpack.c.bf16 %v315_v37, %v311_v36  ;;  %v821_v44 = vpack.c.bf16 %v317_v41, %v313_v38  ;;  %v312_v45 = vld [vmem:[#allocation4 + $0xd0] sm:$0xff]  ;;  %v319_v47 = vld [vmem:[#allocation4 + $0x108] sm:$0xff]  ;;  %v321_v49 = vld [vmem:[#allocation4 + $0x118] sm:$0xff]  ;;  %v759_v51 = vpack.c.bf16 %v314_v43, %v310_v42 }
  0x41   : > { %818 = vmatprep.subr.bf16.mxu1 %v817_v31  ;;  %v316_v46 = vld [vmem:[#allocation4 + $0xf0] sm:$0xff]  ;;  %v323_v48 = vld [vmem:[#allocation4 + $0x128] sm:$0xff]  ;;  %v325_v50 = vld [vmem:[#allocation4 + $0x138] sm:$0xff] }
  0x42   : > { %v823_v52 = vpack.c.bf16 %v316_v46, %v312_v45  ;;  %v761_v53 = vpack.c.bf16 %v323_v48, %v319_v47  ;;  %v318_v54 = vld [vmem:[#allocation4 + $0x100] sm:$0xff]  ;;  %v320_v56 = vld [vmem:[#allocation4 + $0x110] sm:$0xff]  ;;  %v825_v57 = vpack.c.bf16 %v325_v50, %v321_v49  ;;  %v327_v59 = vld [vmem:[#allocation4 + $0x148] sm:$0xff] }
  0x43   : > { %756 = vmatpush1.bf16.msra.mxu0 %v755_v35  ;;  %v322_v55 = vld [vmem:[#allocation4 + $0x120] sm:$0xff]  ;;  %v324_v58 = vld [vmem:[#allocation4 + $0x130] sm:$0xff]  ;;  %v331_v60 = vld [vmem:[#allocation4 + $0x168] sm:$0xff] }
  0x44   : > { %820 = vmatpush1.bf16.msra.mxu1 %v819_v39  ;;  %758 = vmatprep.subr.bf16.mxu0 %v757_v40  ;;  %v329_v61 = vld [vmem:[#allocation4 + $0x158] sm:$0xff]  ;;  %v763_v63 = vpack.c.bf16 %v322_v55, %v318_v54  ;;  %v827_v0 = vpack.c.bf16 %v324_v58, %v320_v56  ;;  %v765_v1 = vpack.c.bf16 %v331_v60, %v327_v59  ;;  %v326_v2 = vld [vmem:[#allocation4 + $0x140] sm:$0xff]  ;;  %v328_v4 = vld [vmem:[#allocation4 + $0x150] sm:$0xff] }
  0x45   : > { %822 = vmatprep.subr.bf16.mxu1 %v821_v44  ;;  %v333_v62 = vld [vmem:[#allocation4 + $0x178] sm:$0xff]  ;;  %v330_v3 = vld [vmem:[#allocation4 + $0x160] sm:$0xff]  ;;  %v332_v6 = vld [vmem:[#allocation4 + $0x170] sm:$0xff] }
  0x46   : > { %v829_v5 = vpack.c.bf16 %v333_v62, %v329_v61  ;;  %v335_v7 = vld [vmem:[#allocation4 + $0x188] sm:$0xff]  ;;  %v337_v9 = vld [vmem:[#allocation4 + $0x198] sm:$0xff]  ;;  %v767_v11 = vpack.c.bf16 %v330_v3, %v326_v2  ;;  %v831_v12 = vpack.c.bf16 %v332_v6, %v328_v4  ;;  %v334_v14 = vld [vmem:[#allocation4 + $0x180] sm:$0xff] }
  0x47   : > { %760 = vmatpush1.bf16.msra.mxu0 %v759_v51  ;;  %v339_v8 = vld [vmem:[#allocation4 + $0x1a8] sm:$0xff]  ;;  %v341_v10 = vld [vmem:[#allocation4 + $0x1b8] sm:$0xff]  ;;  %v338_v15 = vld [vmem:[#allocation4 + $0x1a0] sm:$0xff] }
  0x48   : > { %824 = vmatpush1.bf16.msra.mxu1 %v823_v52  ;;  %762 = vmatprep.subr.bf16.mxu0 %v761_v53  ;;  %v769_v13 = vpack.c.bf16 %v339_v8, %v335_v7  ;;  %v336_v16 = vld [vmem:[#allocation4 + $0x190] sm:$0xff]  ;;  %v833_v17 = vpack.c.bf16 %v341_v10, %v337_v9  ;;  %v343_v19 = vld [vmem:[#allocation4 + $0x1c8] sm:$0xff]  ;;  %v345_v21 = vld [vmem:[#allocation4 + $0x1d8] sm:$0xff]  ;;  %v771_v23 = vpack.c.bf16 %v338_v15, %v334_v14 }
  0x49   : > { %826 = vmatprep.subr.bf16.mxu1 %v825_v57  ;;  %v340_v18 = vld [vmem:[#allocation4 + $0x1b0] sm:$0xff]  ;;  %v347_v20 = vld [vmem:[#allocation4 + $0x1e8] sm:$0xff]  ;;  %v349_v22 = vld [vmem:[#allocation4 + $0x1f8] sm:$0xff] }
  0x4a   : > { %v835_v24 = vpack.c.bf16 %v340_v18, %v336_v16  ;;  %v773_v25 = vpack.c.bf16 %v347_v20, %v343_v19  ;;  %v342_v26 = vld [vmem:[#allocation4 + $0x1c0] sm:$0xff]  ;;  %v344_v28 = vld [vmem:[#allocation4 + $0x1d0] sm:$0xff]  ;;  %v837_v29 = vpack.c.bf16 %v349_v22, %v345_v21  ;;  %v351_v31 = vld [vmem:[#allocation4 + $0x208] sm:$0xff] }
  0x4b   : > { %764 = vmatpush1.bf16.msra.mxu0 %v763_v63  ;;  %v346_v27 = vld [vmem:[#allocation4 + $0x1e0] sm:$0xff]  ;;  %v348_v30 = vld [vmem:[#allocation4 + $0x1f0] sm:$0xff]  ;;  %v355_v32 = vld [vmem:[#allocation4 + $0x228] sm:$0xff] }
  0x4c   : > { %828 = vmatpush1.bf16.msra.mxu1 %v827_v0  ;;  %766 = vmatprep.subr.bf16.mxu0 %v765_v1  ;;  %v353_v33 = vld [vmem:[#allocation4 + $0x218] sm:$0xff]  ;;  %v775_v35 = vpack.c.bf16 %v346_v27, %v342_v26  ;;  %v839_v36 = vpack.c.bf16 %v348_v30, %v344_v28  ;;  %v777_v37 = vpack.c.bf16 %v355_v32, %v351_v31  ;;  %v350_v38 = vld [vmem:[#allocation4 + $0x200] sm:$0xff]  ;;  %v352_v40 = vld [vmem:[#allocation4 + $0x210] sm:$0xff] }
  0x4d   : > { %830 = vmatprep.subr.bf16.mxu1 %v829_v5  ;;  %v357_v34 = vld [vmem:[#allocation4 + $0x238] sm:$0xff]  ;;  %v354_v39 = vld [vmem:[#allocation4 + $0x220] sm:$0xff]  ;;  %v356_v42 = vld [vmem:[#allocation4 + $0x230] sm:$0xff] }
  0x4e   : > { %v841_v41 = vpack.c.bf16 %v357_v34, %v353_v33  ;;  %v359_v43 = vld [vmem:[#allocation4 + $0x248] sm:$0xff]  ;;  %v361_v45 = vld [vmem:[#allocation4 + $0x258] sm:$0xff]  ;;  %v779_v47 = vpack.c.bf16 %v354_v39, %v350_v38  ;;  %v843_v48 = vpack.c.bf16 %v356_v42, %v352_v40  ;;  %v358_v50 = vld [vmem:[#allocation4 + $0x240] sm:$0xff] }
  0x4f   : > { %768 = vmatpush1.bf16.msra.mxu0 %v767_v11  ;;  %v363_v44 = vld [vmem:[#allocation4 + $0x268] sm:$0xff]  ;;  %v365_v46 = vld [vmem:[#allocation4 + $0x278] sm:$0xff]  ;;  %v362_v51 = vld [vmem:[#allocation4 + $0x260] sm:$0xff] }
  0x50   : > { %832 = vmatpush1.bf16.msra.mxu1 %v831_v12  ;;  %770 = vmatprep.subr.bf16.mxu0 %v769_v13  ;;  %v781_v49 = vpack.c.bf16 %v363_v44, %v359_v43  ;;  %v360_v52 = vld [vmem:[#allocation4 + $0x250] sm:$0xff]  ;;  %v845_v53 = vpack.c.bf16 %v365_v46, %v361_v45  ;;  %v367_v55 = vld [vmem:[#allocation4 + $0x288] sm:$0xff]  ;;  %v369_v57 = vld [vmem:[#allocation4 + $0x298] sm:$0xff]  ;;  %v783_v59 = vpack.c.bf16 %v362_v51, %v358_v50 }
  0x51   : > { %834 = vmatprep.subr.bf16.mxu1 %v833_v17  ;;  %v364_v54 = vld [vmem:[#allocation4 + $0x270] sm:$0xff]  ;;  %v371_v56 = vld [vmem:[#allocation4 + $0x2a8] sm:$0xff]  ;;  %v373_v58 = vld [vmem:[#allocation4 + $0x2b8] sm:$0xff] }
  0x52   : > { %v847_v60 = vpack.c.bf16 %v364_v54, %v360_v52  ;;  %v785_v61 = vpack.c.bf16 %v371_v56, %v367_v55  ;;  %v366_v62 = vld [vmem:[#allocation4 + $0x280] sm:$0xff]  ;;  %v368_v0 = vld [vmem:[#allocation4 + $0x290] sm:$0xff]  ;;  %v849_v1 = vpack.c.bf16 %v373_v58, %v369_v57  ;;  %v375_v3 = vld [vmem:[#allocation4 + $0x2c8] sm:$0xff] }
  0x53   : > { %772 = vmatpush1.bf16.msra.mxu0 %v771_v23  ;;  %v370_v63 = vld [vmem:[#allocation4 + $0x2a0] sm:$0xff]  ;;  %v372_v2 = vld [vmem:[#allocation4 + $0x2b0] sm:$0xff]  ;;  %v379_v4 = vld [vmem:[#allocation4 + $0x2e8] sm:$0xff] }
  0x54   : > { %836 = vmatpush1.bf16.msra.mxu1 %v835_v24  ;;  %774 = vmatprep.subr.bf16.mxu0 %v773_v25  ;;  %v377_v5 = vld [vmem:[#allocation4 + $0x2d8] sm:$0xff]  ;;  %v787_v7 = vpack.c.bf16 %v370_v63, %v366_v62  ;;  %v374_v8 = vld [vmem:[#allocation4 + $0x2c0] sm:$0xff]  ;;  %v851_v10 = vpack.c.bf16 %v372_v2, %v368_v0  ;;  %v789_v11 = vpack.c.bf16 %v379_v4, %v375_v3  ;;  %v376_v12 = vld [vmem:[#allocation4 + $0x2d0] sm:$0xff] }
  0x55   : > { %838 = vmatprep.subr.bf16.mxu1 %v837_v29  ;;  %v381_v6 = vld [vmem:[#allocation4 + $0x2f8] sm:$0xff]  ;;  %v378_v9 = vld [vmem:[#allocation4 + $0x2e0] sm:$0xff]  ;;  %v380_v13 = vld [vmem:[#allocation4 + $0x2f0] sm:$0xff] }
  0x56   : > { %v383_v14 = vld [vmem:[#allocation4 + $0x308] sm:$0xff]  ;;  %v853_v15 = vpack.c.bf16 %v381_v6, %v377_v5  ;;  %v385_v17 = vld [vmem:[#allocation4 + $0x318] sm:$0xff]  ;;  %v280_v21 = vld [vmem:[%s1064_s18] sm:$0xff]  ;;  %v791_v22 = vpack.c.bf16 %v378_v9, %v374_v8  ;;  %v855_v27 = vpack.c.bf16 %v380_v13, %v376_v12 }
  0x57   : > { %776 = vmatpush1.bf16.msra.mxu0 %v775_v35  ;;  %v387_v16 = vld [vmem:[#allocation4 + $0x328] sm:$0xff]  ;;  %v389_v19 = vld [vmem:[#allocation4 + $0x338] sm:$0xff]  ;;  %v382_v23 = vld [vmem:[#allocation4 + $0x300] sm:$0xff] }
  0x58   : > { %840 = vmatpush1.bf16.msra.mxu1 %v839_v36  ;;  %778 = vmatprep.subr.bf16.mxu0 %v777_v37  ;;  %v281_v18 = vld [vmem:[%s1064_s18 + $0x8] sm:$0xff]  ;;  %v386_v24 = vld [vmem:[#allocation4 + $0x320] sm:$0xff]  ;;  %v793_v28 = vpack.c.bf16 %v387_v16, %v383_v14  ;;  %v384_v29 = vld [vmem:[#allocation4 + $0x310] sm:$0xff]  ;;  %v857_v33 = vpack.c.bf16 %v389_v19, %v385_v17 }
  0x59   : > { %842 = vmatprep.subr.bf16.mxu1 %v841_v41  ;;  %v283_v20 = vld [vmem:[%s1103_s1 + $0x8] sm:$0xff]  ;;  %v282_v26 = vld [vmem:[%s1103_s1] sm:$0xff]  ;;  %v388_v30 = vld [vmem:[#allocation4 + $0x330] sm:$0xff]  ;;  %v795_v41 = vpack.c.bf16 %v386_v24, %v382_v23 }
  0x5a   : > { %v285_v25 = vsub.f32 %v281_v18, %v283_v20  ;;  %v583_v31 = vld [vmem:[#allocation3 + $0x8] sm:$0xff]  ;;  %v1075_v32 = vsub.f32 %v280_v21, %v282_v26  ;;  %v391_v34 = vld [vmem:[#allocation4 + $0x348] sm:$0xff]  ;;  %v582_v37 = vld [vmem:[#allocation3] sm:$0xff]  ;;  %v859_v43 = vpack.c.bf16 %v388_v30, %v384_v29 }
  0x5b   : > { %780 = vmatpush1.bf16.msra.mxu0 %v779_v47  ;;  %v395_v35 = vld [vmem:[#allocation4 + $0x368] sm:$0xff]  ;;  %v393_v38 = vld [vmem:[#allocation4 + $0x358] sm:$0xff]  ;;  %v390_v45 = vld [vmem:[#allocation4 + $0x340] sm:$0xff] }
  0x5c   : > { %844 = vmatpush1.bf16.msra.mxu1 %v843_v48  ;;  %782 = vmatprep.subr.bf16.mxu0 %v781_v49  ;;  %v585_v36 = vand.u32 2147483647, %v285_v25  ;;  %v397_v39 = vld [vmem:[#allocation4 + $0x378] sm:$0xff]  ;;  %v584_v40 = vand.u32 2147483647, %v1075_v32  ;;  %v797_v44 = vpack.c.bf16 %v395_v35, %v391_v34  ;;  %v394_v46 = vld [vmem:[#allocation4 + $0x360] sm:$0xff] }
  0x5d   : > { %846 = vmatprep.subr.bf16.mxu1 %v845_v53  ;;  %478 = vmatprep.mubr.f32.mxu0 %v285_v25  ;;  %v392_v47 = vld [vmem:[#allocation4 + $0x350] sm:$0xff]  ;;  %v861_v49 = vpack.c.bf16 %v397_v39, %v393_v38  ;;  %v399_v51 = vld [vmem:[#allocation4 + $0x388] sm:$0xff]  ;;  %v401_v53 = vld [vmem:[#allocation4 + $0x398] sm:$0xff]  ;;  %v799_v55 = vpack.c.bf16 %v394_v46, %v390_v45 }
  0x5e   : > { %549 = vmatprep.mubr.f32.mxu1 %v285_v25  ;;  %v587_v42 = vadd.f32 %v585_v36, %v583_v31  ;;  %v586_v48 = vadd.f32 %v584_v40, %v582_v37  ;;  %v396_v50 = vld [vmem:[#allocation4 + $0x370] sm:$0xff]  ;;  %v403_v52 = vld [vmem:[#allocation4 + $0x3a8] sm:$0xff]  ;;  %v405_v54 = vld [vmem:[#allocation4 + $0x3b8] sm:$0xff] }
  0x5f   : > { %784 = vmatpush1.bf16.msra.mxu0 %v783_v59  ;;  %v863_v56 = vpack.c.bf16 %v396_v50, %v392_v47  ;;  %v801_v57 = vpack.c.bf16 %v403_v52, %v399_v51  ;;  %v398_v58 = vld [vmem:[#allocation4 + $0x380] sm:$0xff]  ;;  %v404_v62 = vld [vmem:[#allocation4 + $0x3b0] sm:$0xff]  ;;  %v407_v63 = vld [vmem:[#allocation4 + $0x3c8] sm:$0xff] }
  0x60   : > { %848 = vmatpush1.bf16.msra.mxu1 %v847_v60  ;;  %786 = vmatprep.subr.bf16.mxu0 %v785_v61  ;;  %589 = vst [vmem:[#allocation3 + $0x8] sm:$0xff] %v587_v42  ;;  %588 = vst [vmem:[#allocation3] sm:$0xff] %v586_v48  ;;  %v402_v59 = vld [vmem:[#allocation4 + $0x3a0] sm:$0xff]  ;;  %v400_v60 = vld [vmem:[#allocation4 + $0x390] sm:$0xff]  ;;  %v865_v61 = vpack.c.bf16 %v405_v54, %v401_v53 }
  0x61   : > { %850 = vmatprep.subr.bf16.mxu1 %v849_v1  ;;  %v411_v0 = vld [vmem:[#allocation4 + $0x3e8] sm:$0xff]  ;;  %v409_v1 = vld [vmem:[#allocation4 + $0x3d8] sm:$0xff]  ;;  %v803_v3 = vpack.c.bf16 %v402_v59, %v398_v58  ;;  %v867_v4 = vpack.c.bf16 %v404_v62, %v400_v60  ;;  %v406_v6 = vld [vmem:[#allocation4 + $0x3c0] sm:$0xff] }
  0x62   : > { %v413_v2 = vld [vmem:[#allocation4 + $0x3f8] sm:$0xff]  ;;  %v805_v5 = vpack.c.bf16 %v411_v0, %v407_v63  ;;  %v408_v9 = vld [vmem:[#allocation4 + $0x3d0] sm:$0xff]  ;;  %v556_v26 = vld [vmem:[#allocation2] sm:$0xff] }
  0x63   : > { %788 = vmatpush1.bf16.msra.mxu0 %v787_v7  ;;  %v410_v7 = vld [vmem:[#allocation4 + $0x3e0] sm:$0xff]  ;;  %v869_v8 = vpack.c.bf16 %v413_v2, %v409_v1  ;;  %v557_v30 = vld [vmem:[#allocation2 + $0x8] sm:$0xff] }
  0x64   : > { %852 = vmatpush1.bf16.msra.mxu1 %v851_v10  ;;  %790 = vmatprep.subr.bf16.mxu0 %v789_v11  ;;  %v412_v10 = vld [vmem:[#allocation4 + $0x3f0] sm:$0xff]  ;;  %v807_v11 = vpack.c.bf16 %v410_v7, %v406_v6 }
  0x65   : > { %854 = vmatprep.subr.bf16.mxu1 %v853_v15  ;;  %v871_v12 = vpack.c.bf16 %v412_v10, %v408_v9 }
  0x67   : > { %792 = vmatpush1.bf16.msra.mxu0 %v791_v22  ;;  %v596_v39 = vld [vmem:[#allocation3] sm:$0xff] (!%p739_p6)  ;;  %v597_v40 = vld [vmem:[#allocation3 + $0x8] sm:$0xff] (!%p739_p6) }
  0x68   : > { %856 = vmatpush1.bf16.msra.mxu1 %v855_v27  ;;  %794 = vmatprep.subr.bf16.mxu0 %v793_v28  ;;  %600 = vst [vmem:[%s1106_s4] sm:$0xff] (!%p739_p6), %v596_v39  ;;  %601 = vst [vmem:[%s1106_s4 + $0x8] sm:$0xff] (!%p739_p6), %v597_v40 }
  0x69   : > { %858 = vmatprep.subr.bf16.mxu1 %v857_v33 }
  0x6b   : > { %796 = vmatpush1.bf16.msra.mxu0 %v795_v41 }
  0x6c   : > { %860 = vmatpush1.bf16.msra.mxu1 %v859_v43  ;;  %798 = vmatprep.subr.bf16.mxu0 %v797_v44 }
  0x6d   : > { %862 = vmatprep.subr.bf16.mxu1 %v861_v49 }
  0x6f   : > { %800 = vmatpush1.bf16.msra.mxu0 %v799_v55 }
  0x70   : > { %864 = vmatpush1.bf16.msra.mxu1 %v863_v56  ;;  %802 = vmatprep.subr.bf16.mxu0 %v801_v57 }
  0x71   : > { %866 = vmatprep.subr.bf16.mxu1 %v865_v61 }
  0x73   : > { %804 = vmatpush1.bf16.msra.mxu0 %v803_v3 }
  0x74   : > { %868 = vmatpush1.bf16.msra.mxu1 %v867_v4  ;;  %806 = vmatprep.subr.bf16.mxu0 %v805_v5 }
  0x75   : > { %870 = vmatprep.subr.bf16.mxu1 %v869_v8 }
  0x77   : > { %808 = vmatpush1.bf16.msra.mxu0 %v807_v11 }
  0x78   : > { %872 = vmatpush1.bf16.msra.mxu1 %v871_v12 }
  0x7a   : > { %479 = vmatmul.mubr.f32.vlgmr.msra.gmra.mrb[0].mxu0 %v1075_v32 }
  0x7b   : > { %550 = vmatmul.mubr.f32.vlgmr.msra.gmra.mrb[0].mxu1 %v1075_v32 }
 0x14d   : > { %v480_v13 = vpop.f32.mrb[0].mxu0 }
 0x14e   : > { %v558_v14 = vmul.f32 %v480_v13, %v480_v13  ;;  %v551_v15 = vpop.f32.mrb[0].mxu1  ;;  %v482_v16 = vpop.f32.mrb[1].mxu0 }
 0x14f   : > { %v560_v17 = vmul.f32 %v551_v15, %v551_v15  ;;  %v559_v18 = vmul.f32 %v482_v16, %v482_v16  ;;  %v553_v19 = vpop.f32.mrb[1].mxu1 }
 0x150   : > { %v561_v20 = vmul.f32 %v553_v19, %v553_v19 }
 0x151   : > { %v562_v21 = vadd.f32 %v560_v17, %v558_v14 }
 0x152   : > { %v563_v22 = vadd.f32 %v561_v20, %v559_v18 }
 0x153   : > { %911 = vrsqrt.f32 %v562_v21  ;;  %vm566_vm0 = vcmp.eq.f32.partialorder %v562_v21, inf  ;;  %v569_v27 = vand.u32 2147483648, %v562_v21  ;;  %vm568_vm1 = vcmp.eq.f32.partialorder %v562_v21, 0.0 }
 0x154   : > { %913 = vrsqrt.f32 %v563_v22  ;;  %vm573_vm2 = vcmp.eq.f32.partialorder %v563_v22, inf  ;;  %v576_v31 = vand.u32 2147483648, %v563_v22  ;;  %vm575_vm3 = vcmp.eq.f32.partialorder %v563_v22, 0.0 }
 0x15d   : > { %v912_v23 = vpop.eup %911 }
 0x15e   : > { %v914_v24 = vpop.eup %913  ;;  %v565_v25 = vmul.f32 %v912_v23, %v562_v21 }
 0x15f   : > { %v572_v28 = vmul.f32 %v914_v24, %v563_v22  ;;  %593 = sbr.rel (%p739_p6) target bundleno = 366 (0x16e), region = 44 }
 0x160   : > { %v567_v29 = vsel %vm566_vm0, %v562_v21, %v565_v25 }
 0x161   : > { %v570_v32 = vsel %vm568_vm1, %v569_v27, %v567_v29  ;;  %v574_v33 = vsel %vm573_vm2, %v563_v22, %v572_v28 }
 0x162   : > { %v578_v34 = vadd.f32 %v570_v32, %v556_v26  ;;  %v577_v35 = vsel %vm575_vm3, %v576_v31, %v574_v33 }
 0x163   : > { %v579_v36 = vadd.f32 %v577_v35, %v557_v30 }
 0x164   : > { %580 = vst [vmem:[#allocation2] sm:$0xff] %v578_v34 }
 0x165   : > { %581 = vst [vmem:[#allocation2 + $0x8] sm:$0xff] %v579_v36 }
 0x16b   : > { %v594_v37 = vld [vmem:[#allocation2] sm:$0xff] }
 0x16c   : > { %v595_v38 = vld [vmem:[#allocation2 + $0x8] sm:$0xff]  ;;  %598 = vst [vmem:[%s1105_s3] sm:$0xff] %v594_v37 }
 0x16d   : > { %599 = vst [vmem:[%s1105_s3 + $0x8] sm:$0xff] %v595_v38 }
 0x16e PF: > { %s16_s17 = sadd.s32 1, %s969_s17   ;;  %s1115_s15 = smov %s965_s16 }
 0x16f   : > { %p13_p8 = scmp.ge.s32.totalorder %s16_s17, 4   ;;  %s1116_s16 = smov %s1118_s19 }
 0x171   :  { %15 = sbr.rel (!%p13_p8) target bundleno = 2 (0x2), region = 90 }
 0x178   :  { %639 = vsyncpa [#allocation5], 1 }
 0x179   :  { %641 = vsyncpa [#allocation5 + $0x1], 1 }

</bundles_post_ra>
